<compile_context>
chip_gen: v7x
topology: tpu7x:2x2x1
jax: 0.10.0
libtpu: 0.0.40
codegen_flags: <defaults>
</compile_context>

<pallas_src>
import functools

import jax
import jax.numpy as jnp
from jax.experimental import pallas as pl
from jax.experimental.pallas import tpu as pltpu


def _round_up(x, m):
    return ((x + m - 1) // m) * m


def _cdiv(a, b):
    return (a + b - 1) // b


def _tile_bytes(rows, cols, itemsize):
    """Approximate VMEM bytes of one buffered tile (rounded to (8,128) tiling)."""
    return _round_up(max(rows, 1), 8) * _round_up(max(cols, 1), 128) * itemsize


def _vmem_ceiling():
    """Per-generation VMEM budget with headroom for Mosaic internal scratch."""
    try:
        cap = int(pltpu.get_tpu_info().vmem_capacity_bytes)
    except Exception:
        return 64 << 20  # unknown generation: conservative, known-good cap
    # v7x: 64 MiB -> 48 MiB budget; v5e/v6e: 128 MiB -> 112 MiB budget.
    return max(cap - (16 << 20), cap // 2)


def _vmem_limit(nbytes, ceiling):
    return int(min(max(nbytes + (4 << 20), 32 << 20), ceiling))


# ----------------------------- kernels --------------------------------------


def _kernel_noagg(x_ref, w_ref, b_ref, o_ref):
    # x_ref: (tm, F_in), w_ref: (F_in, F_out), b_ref: (1, F_out), o_ref: (tm, F_out)
    support = jnp.dot(x_ref[...], w_ref[...], preferred_element_type=jnp.float32)
    o_ref[...] = (support + b_ref[...]).astype(o_ref.dtype)


def _kernel_agg_xw_first(x_ref, lap_ref, w_ref, b_ref, o_ref, support_ref):
    # support = x_b @ W computed once per batch (row tile 0), reused across all
    # row tiles of lap.  Used when rounded(F_in) >= rounded(F_out).
    @pl.when(pl.program_id(1) == 0)
    def _():
        support_ref[...] = jnp.dot(
            x_ref[...], w_ref[...], preferred_element_type=jnp.float32
        )

    out = jnp.dot(lap_ref[...], support_ref[...], preferred_element_type=jnp.float32)
    o_ref[...] = (out + b_ref[...]).astype(o_ref.dtype)


def _kernel_agg_lap_first(x_ref, lap_ref, w_ref, b_ref, o_ref):
    # (lap_tile @ x_b) @ W : the N^2 matmul contracts over F_in, which is the
    # cheaper order when rounded(F_in) < rounded(F_out).
    agg = jnp.dot(lap_ref[...], x_ref[...], preferred_element_type=jnp.float32)
    out = jnp.dot(agg, w_ref[...], preferred_element_type=jnp.float32)
    o_ref[...] = (out + b_ref[...]).astype(o_ref.dtype)


# ----------------------------- wrappers --------------------------------------


def _no_agg(x, w, b2d, F_out):
    """layer >= 2: out = (x @ W) + bias, as one row-tiled 2-D matmul."""
    B, N, F_in = x.shape
    itemsize = jnp.dtype(x.dtype).itemsize
    ceiling = _vmem_ceiling()

    M = B * N
    x2 = x.reshape(M, F_in)  # free (contiguity-preserving)

    def blk_bytes(tm_):
        return (
            2 * _tile_bytes(tm_, F_in, itemsize)
            + 2 * _tile_bytes(F_in, F_out, itemsize)
            + 2 * _tile_bytes(1, F_out, 4)
            + 2 * _tile_bytes(tm_, F_out, itemsize)
        )

    target = 1024  # HBM-bound: big tiles amortize per-step overhead
    if M <= target:
        tm = M  # block dim == full array dim: always legal
    else:
        tm = target  # multiple of 8
        while tm > 128 and blk_bytes(tm) + (4 << 20) > ceiling:
            tm //= 2

    out = pl.pallas_call(
        _kernel_noagg,
        out_shape=jax.ShapeDtypeStruct((M, F_out), x.dtype),
        grid_spec=pltpu.PrefetchScalarGridSpec(
            num_scalar_prefetch=0,
            grid=(_cdiv(M, tm),),
            in_specs=[
                pl.BlockSpec((tm, F_in), lambda i: (i, 0)),     # x row tile
                pl.BlockSpec((F_in, F_out), lambda i: (0, 0)),  # shared weight
                pl.BlockSpec((1, F_out), lambda i: (0, 0)),     # shared bias
            ],
            out_specs=pl.BlockSpec((tm, F_out), lambda i: (i, 0)),
        ),
        compiler_params=pltpu.CompilerParams(
            dimension_semantics=("parallel",),
            vmem_limit_bytes=_vmem_limit(blk_bytes(tm), ceiling),
        ),
    )(x2, w, b2d)

    return out.reshape(B, N, F_out)


def _agg(x, lap, w, b2d, F_out):
    """layer < 2: out = lap @ (x @ W) + bias, with row-tiled lap (no padding)."""
    B, N, F_in = x.shape
    itemsize = jnp.dtype(x.dtype).itemsize
    ceiling = _vmem_ceiling()

    # Matmul-order heuristic on MXU-tile-rounded widths (128-lane tiles).
    # Ties -> xw_first (once-per-batch x@W reuse, single matmul per row tile).
    lap_first = _cdiv(F_in, 128) < _cdiv(F_out, 128)

    def blk_bytes(tm_, with_scratch):
        b = (
            2 * _tile_bytes(N, F_in, itemsize)     # full x per batch
            + 2 * _tile_bytes(tm_, N, itemsize)    # lap row tile
            + 2 * _tile_bytes(F_in, F_out, itemsize)
            + 2 * _tile_bytes(1, F_out, 4)
            + 2 * _tile_bytes(tm_, F_out, itemsize)
        )
        if with_scratch:
            b += _tile_bytes(N, F_out, 4)          # f32 support scratch (single)
        return b

    target = 512
    if N <= target:
        tm = N  # block dim == full array dim: always legal, no edge tiles
    else:
        tm = target  # multiple of 8
        while tm > 64 and blk_bytes(tm, not lap_first) + (4 << 20) > ceiling:
            tm //= 2

    # If the xw_first working set (full-N f32 scratch) still does not fit,
    # fall back to lap_first which needs no scratch.
    if (not lap_first) and blk_bytes(tm, True) + (4 << 20) > ceiling:
        lap_first = True

    in_specs = [
        pl.BlockSpec((None, N, F_in), lambda b, r: (b, 0, 0)),  # full x per batch
        pl.BlockSpec((None, tm, N), lambda b, r: (b, r, 0)),    # lap row tile
        pl.BlockSpec((F_in, F_out), lambda b, r: (0, 0)),       # shared weight
        pl.BlockSpec((1, F_out), lambda b, r: (0, 0)),          # shared bias
    ]
    out_specs = pl.BlockSpec((None, tm, F_out), lambda b, r: (b, r, 0))

    if lap_first:
        kernel = _kernel_agg_lap_first
        scratch_shapes = []
        dims = ("parallel", "parallel")
    else:
        kernel = _kernel_agg_xw_first
        scratch_shapes = [pltpu.VMEM((N, F_out), jnp.float32)]
        # r-axis must run in order so the pl.when(r == 0) support compute is
        # seen before the row tiles that consume it.
        dims = ("parallel", "arbitrary")

    out = pl.pallas_call(
        kernel,
        out_shape=jax.ShapeDtypeStruct((B, N, F_out), x.dtype),
        grid_spec=pltpu.PrefetchScalarGridSpec(
            num_scalar_prefetch=0,
            grid=(B, _cdiv(N, tm)),
            in_specs=in_specs,
            out_specs=out_specs,
            scratch_shapes=scratch_shapes,
        ),
        compiler_params=pltpu.CompilerParams(
            dimension_semantics=dims,
            vmem_limit_bytes=_vmem_limit(blk_bytes(tm, not lap_first), ceiling),
        ),
    )(x, lap, w, b2d)

    return out


@functools.partial(jax.jit, static_argnames=("layer",))
def batch_graph_sum(x, lap, weight, bias, *, layer):
    """Pallas implementation of BatchGraphSUM.forward.

    x:      (B, N, F_in)
    lap:    (B, N, N)      (only touched by the kernel when layer < 2)
    weight: (F_in, F_out)
    bias:   (F_out,) or None
    layer:  python int (static) -- aggregation with lap only when layer < 2
    (model_type from the PyTorch forward is unused there and is ignored here.)
    """
    B, N, F_in = x.shape
    F_out = weight.shape[1]
    if bias is None:
        bias = jnp.zeros((F_out,), dtype=jnp.float32)

    w = weight.astype(x.dtype)
    b2d = bias.astype(jnp.float32).reshape(1, F_out)

    if layer >= 2:
        return _no_agg(x, w, b2d, F_out)
    return _agg(x, lap, w, b2d, F_out)


# ----------------------------- reference & test -----------------------------


def _reference(x, lap, weight, bias, layer):
    support = jnp.einsum("bnf,fo->bno", x, weight)
    out = jnp.einsum("bnm,bmo->bno", lap, support) if layer < 2 else support
    return out + bias


if __name__ == "__main__":
    key = jax.random.PRNGKey(0)
    ok = True

    # (B, N, F_in, F_out):
    #   config 0: xw_first agg path (rounded widths tie -> reuse path)
    #   config 1: xw_first agg path, N not a multiple of 8, F_out not a
    #             multiple of 128 (masked stores, no padding/slice passes)
    #   config 2: lap_first agg path (rounded F_in < rounded F_out)
    configs = [
        (2, 16, 32, 32),
        (2, 12, 160, 64),
        (2, 24, 32, 256),
    ]

    for (B, N, F_IN, F_OUT) in configs:
        kx, klap, kw, key = jax.random.split(key, 4)

        x = jax.random.normal(kx, (B, N, F_IN), dtype=jnp.float32)
        lap_raw = jax.random.uniform(klap, (B, N, N), dtype=jnp.float32)
        lap = lap_raw / jnp.sum(lap_raw, axis=-1, keepdims=True)

        # Deterministic xavier_uniform_-style weight, zero bias (as in __init__).
        bound = (6.0 / (F_IN + F_OUT)) ** 0.5
        weight = jax.random.uniform(
            kw, (F_IN, F_OUT), dtype=jnp.float32, minval=-bound, maxval=bound
        )
        bias = jnp.zeros((F_OUT,), dtype=jnp.float32)

        for layer in (0, 2):  # layer < 2 (aggregate) and layer >= 2 (no agg)
            out = batch_graph_sum(x, lap, weight, bias, layer=layer)
            out = jax.block_until_ready(out)
            ref = _reference(x, lap, weight, bias, layer)
            if out.shape != ref.shape or not jnp.allclose(
                out, ref, atol=1e-3, rtol=1e-3
            ):
                ok = False
                print(
                    f"MISMATCH: B={B} N={N} F_in={F_IN} F_out={F_OUT} layer={layer}"
                )

    if ok:
        print("KERNEL_OK")
</pallas_src>

<mosaic_0001>
module attributes {stable_mosaic.version = 11 : i64} {
  func.func @_kernel_agg_xw_first(%arg0: i32, %arg1: i32, %arg2: memref<1x16x32xf32, #tpu.memory_space<vmem>>, %arg3: memref<1x16x16xf32, #tpu.memory_space<vmem>>, %arg4: memref<32x32xf32, #tpu.memory_space<vmem>>, %arg5: memref<1x32xf32, #tpu.memory_space<vmem>>, %arg6: memref<1x16x32xf32, #tpu.memory_space<vmem>>, %arg7: memref<16x32xf32, #tpu.memory_space<vmem>>) attributes {dimension_semantics = [#tpu.dimension_semantics<parallel>, #tpu.dimension_semantics<arbitrary>], iteration_bounds = array<i64: 2, 1>, scalar_prefetch = 0 : i64, scratch_operands = 1 : i64, tpu.core_type = #tpu.core_type<tc>, window_params = [{transform_indices = @transform_0, window_bounds = array<i64: 1, 16, 32>}, {transform_indices = @transform_1, window_bounds = array<i64: 1, 16, 16>}, {pipeline_mode = #tpu.pipeline_mode<synchronous>, transform_indices = @transform_2, window_bounds = array<i64: 32, 32>}, {pipeline_mode = #tpu.pipeline_mode<synchronous>, transform_indices = @transform_3, window_bounds = array<i64: 1, 32>}, {transform_indices = @transform_4, window_bounds = array<i64: 1, 16, 32>}]} {
    %c0_i32 = arith.constant 0 : i32
    %0 = arith.cmpi eq, %arg1, %c0_i32 : i32
    %1 = arith.extui %0 : i1 to i32
    %c0_i32_0 = arith.constant 0 : i32
    %2 = arith.cmpi ne, %1, %c0_i32_0 : i32
    scf.if %2 {
      %c0_10 = arith.constant 0 : index
      %c0_11 = arith.constant 0 : index
      %c0_12 = arith.constant 0 : index
      %13 = vector.load %arg2[%c0_10, %c0_11, %c0_12] : memref<1x16x32xf32, #tpu.memory_space<vmem>>, vector<1x16x32xf32>
      %14 = vector.shape_cast %13 : vector<1x16x32xf32> to vector<16x32xf32>
      %c0_13 = arith.constant 0 : index
      %c0_14 = arith.constant 0 : index
      %15 = vector.load %arg4[%c0_13, %c0_14] : memref<32x32xf32, #tpu.memory_space<vmem>>, vector<32x32xf32>
      %cst_15 = arith.constant dense<0.000000e+00> : vector<16x32xf32>
      %16 = tpu.matmul %14, %15, %cst_15 {dimension_numbers = #tpu.dot_dimension_numbers<[1], [0], [0], [1], [0, 0, 1, 1], [], []>} : vector<16x32xf32>, vector<32x32xf32>, vector<16x32xf32> -> vector<16x32xf32>
      %c0_16 = arith.constant 0 : index
      %c0_17 = arith.constant 0 : index
      %17 = vector.load %arg7[%c0_16, %c0_17] : memref<16x32xf32, #tpu.memory_space<vmem>>, vector<16x32xf32>
      tpu.vector_store %arg7[%c0_16, %c0_17], %16 {strides = array<i32>} : memref<16x32xf32, #tpu.memory_space<vmem>>, vector<16x32xf32>,
    } else {
    }
    %c0 = arith.constant 0 : index
    %c0_1 = arith.constant 0 : index
    %c0_2 = arith.constant 0 : index
    %3 = vector.load %arg3[%c0, %c0_1, %c0_2] : memref<1x16x16xf32, #tpu.memory_space<vmem>>, vector<1x16x16xf32>
    %4 = vector.shape_cast %3 : vector<1x16x16xf32> to vector<16x16xf32>
    %c0_3 = arith.constant 0 : index
    %c0_4 = arith.constant 0 : index
    %5 = vector.load %arg7[%c0_3, %c0_4] : memref<16x32xf32, #tpu.memory_space<vmem>>, vector<16x32xf32>
    %cst = arith.constant dense<0.000000e+00> : vector<16x32xf32>
    %6 = tpu.matmul %4, %5, %cst {dimension_numbers = #tpu.dot_dimension_numbers<[1], [0], [0], [1], [0, 0, 1, 1], [], []>} : vector<16x16xf32>, vector<16x32xf32>, vector<16x32xf32> -> vector<16x32xf32>
    %c0_5 = arith.constant 0 : index
    %c0_6 = arith.constant 0 : index
    %7 = vector.load %arg5[%c0_5, %c0_6] : memref<1x32xf32, #tpu.memory_space<vmem>>, vector<1x32xf32>
    %8 = vector.broadcast %7 : vector<1x32xf32> to vector<16x32xf32>
    %9 = arith.addf %6, %8 : vector<16x32xf32>
    %c0_7 = arith.constant 0 : index
    %c0_8 = arith.constant 0 : index
    %c0_9 = arith.constant 0 : index
    %10 = vector.load %arg6[%c0_7, %c0_8, %c0_9] : memref<1x16x32xf32, #tpu.memory_space<vmem>>, vector<1x16x32xf32>
    %11 = vector.shape_cast %10 : vector<1x16x32xf32> to vector<16x32xf32>
    %12 = vector.shape_cast %9 : vector<16x32xf32> to vector<1x16x32xf32>
    tpu.vector_store %arg6[%c0_7, %c0_8, %c0_9], %12 {strides = array<i32>} : memref<1x16x32xf32, #tpu.memory_space<vmem>>, vector<1x16x32xf32>,
    return
  }
  func.func @transform_0(%arg0: i32, %arg1: i32) -> (i32, i32, i32) {
    %c0_i32 = arith.constant 0 : i32
    %c0_i32_0 = arith.constant 0 : i32
    %c0_i32_1 = arith.constant 0 : i32
    return %arg0, %c0_i32, %c0_i32_0 : i32, i32, i32
  }
  func.func @transform_1(%arg0: i32, %arg1: i32) -> (i32, i32, i32) {
    %c0_i32 = arith.constant 0 : i32
    %c0_i32_0 = arith.constant 0 : i32
    return %arg0, %arg1, %c0_i32 : i32, i32, i32
  }
  func.func @transform_2(%arg0: i32, %arg1: i32) -> (i32, i32) {
    %c0_i32 = arith.constant 0 : i32
    %c0_i32_0 = arith.constant 0 : i32
    %c0_i32_1 = arith.constant 0 : i32
    return %c0_i32, %c0_i32_0 : i32, i32
  }
  func.func @transform_3(%arg0: i32, %arg1: i32) -> (i32, i32) {
    %c0_i32 = arith.constant 0 : i32
    %c0_i32_0 = arith.constant 0 : i32
    %c0_i32_1 = arith.constant 0 : i32
    return %c0_i32, %c0_i32_0 : i32, i32
  }
  func.func @transform_4(%arg0: i32, %arg1: i32) -> (i32, i32, i32) {
    %c0_i32 = arith.constant 0 : i32
    %c0_i32_0 = arith.constant 0 : i32
    return %arg0, %arg1, %c0_i32 : i32, i32, i32
  }
}

</mosaic_0001>

<bundles_post_ra>
// kernel: batch_graph_sum.1
= control target key start
LH: loop header
LB: loop body
LE: loop exit
PB: predicated region body
PF: predicated region fallthrough
CT: control target
= control target key end

     0   :  { %s1263_s0 = inlined_call_operand.hbm [shape: f32[2,16,32], index: 0, kind: input, shape index: {}]   ;;  %s1264_s1 = inlined_call_operand.hbm [shape: f32[2,16,16], index: 1, kind: input, shape index: {}]   ;;  %s1265_s2 = inlined_call_operand.hbm [shape: f32[32,32], index: 2, kind: input, shape index: {}]   ;;  %s1266_s3 = inlined_call_operand.vmem [shape: f32[1,32], index: 3, kind: input, shape index: {}]   ;;  %s1267_s4 = inlined_call_operand.hbm [shape: f32[2,16,32], index: 4, kind: output, shape index: {}]  }
   0x1   :  { %1276 = sst [smem:[#allocation15_spill]] %s1263_s0 }
   0x2   :  { %1277 = sst [smem:[#allocation16_spill]] %s1265_s2 }
   0x3   :  { %9 = vsyncpa [#allocation4], 0 }
   0x4   :  { %11 = vsyncpa [#allocation4 + $0x1], 0 }
   0x5   :  { %12 = vsyncpa [#allocation7], 0 }
   0x6   :  { %14 = vsyncpa [#allocation7 + $0x1], 0 }
   0x7   :  { %15 = vsyncpa [#allocation5], 0 }
   0x8   :  { %17 = vsyncpa [#allocation5 + $0x1], 0  ;;  %s979_s15 = smov 0   ;;  %s981_s16 = smov 0  }
   0x9   :  { %s983_s17 = smov 0   ;;  %s985_s18 = smov 0  }
   0xa   :  { %s987_s19 = smov 0   ;;  %s989_s20 = smov 0  }
   0xb LB: > { %s1010_s21 = sadd.s32 4294967295, %s944_s20   ;;  %s616_s22 = sadd.s32 4294967294, %s944_s20   ;;  %s944_s20 = sphi %s989_s20, %s23_s20   ;;  %s940_s19 = sphi %s987_s19, %s1302_s19   ;;  %s936_s18 = sphi %s985_s18, %s1301_s18   ;;  %s932_s17 = sphi %s983_s17, %s1300_s17   ;;  %s928_s16 = sphi %s981_s16, %s1299_s16   ;;  %s924_s15 = sphi %s979_s15, %s1298_s15  }
   0xc   : > { %p55_p0 = scmp.ne.s32.totalorder %s928_s16, %s924_s15  ;;  %p1268_p1 = scmp.eq.s32.totalorder %s1010_s21, 0 }
   0xd   : > { %p157_p3 = scmp.eq.s32.totalorder %s616_s22, 1  ;;  %p617_p5 = scmp.ge.s32.totalorder %s944_s20, 1 }
   0xe   : > { %p1019_p4 = por %p1268_p1, %p55_p0  ;;  %p164_p7 = scmp.lt.s32.totalorder %s944_s20, 3 }
   0xf   : > { %p1024_p6 = por %p157_p3, %p55_p0  ;;  %s946_s26 = smov [#allocation8]  }
  0x10   : > { %s1278_s23 = scalar_select %p1019_p4, 1, 0 }
  0x11   : > { %s1279_s24 = scalar_select %p1024_p6, 1, 0 }
  0x12   : > { %p1029_p8 = pnand %p617_p5, %p164_p7  ;;  %s176_s27 = sshll.u32 %s946_s26, 4  ;;  %s177_s27 = int_to_ptr.vmem [resolvable:$true] %s176_s27 }
  0x13   : > { %s35_s29 = sadd.s32 1, %s940_s19  ;;  %s1282_s2 = sld [smem:[#allocation16_spill]] }
  0x14   : > { %s1280_s25 = scalar_select %p1029_p8, 1, 0 }
  0x15   : > { %p694_p9 = pneg %p1029_p8 }
  0x17   : > { %p1038_p11 = pnand %p694_p9, %p1268_p1 }
  0x19   : > { %s766_s6 = scalar_lea.hbm %s1282_s2, 512  ;;  %p768_p13 = pneg %p1038_p11 }
  0x1a   : > { %p767_p12 = scmp.ne.s32.totalorder %s1282_s2, %s766_s6  ;;  %p773_p5 = scmp.lt.u32.totalorder %s766_s6, %s1282_s2 }
  0x1c   : > { %p769_p0 = pnand %p768_p13, %p767_p12 }
  0x1e   : > { %p770_p3 = pneg %p769_p0 }
  0x20   : > { %p775_p7 = pnand %p773_p5, %p770_p3 }
  0x22   : > { %778 = shalt.err (!%p775_p7)
}
  0x23   : > { %s779_s11 = scalar_lea.vmem %s177_s27, 512  ;;  %p787_p2 = scmp.lt.s32.totalorder %s177_s27, %s177_s27 }
  0x24   : > { %p780_p9 = scmp.ne.s32.totalorder %s177_s27, %s779_s11  ;;  %p788_p6 = scmp.lt.s32.totalorder %s779_s11, %s779_s11 }
  0x26   : > { %p782_p10 = pnand %p780_p9, %p768_p13  ;;  %p789_p4 = por %p788_p6, %p787_p2 }
  0x28   : > { %p783_p1 = pneg %p782_p10 }
  0x2a   : > { %p790_p8 = pnand %p789_p4, %p783_p1 }
  0x2c   : > { %793 = shalt.err (!%p790_p8)
}
  0x2d   : > { %s1271_s12 = smov 128   ;;  %s1273_s13 = smov 8  }
  0x2e   : > { %697 = dma.hbm_to_vmem [thread:$0]  (!%p1038_p11), %s1282_s2, 512, %s177_s27, [#allocation7], %s1271_s12, %s1271_s12, %s1273_s13  }
  0x2f   : > { %p37_p1 = scmp.ge.s32.totalorder %s35_s29, 2  ;;  %s42_s26 = sadd.s32 1, %s932_s17 }
  0x30   : > { %p49_p2 = scmp.ne.s32.totalorder %s932_s17, %s928_s16  ;;  %p50_p4 = scmp.eq.s32.totalorder %s944_s20, 0 }
  0x31   : > { %s1304_s29 = smov (%p37_p1, %s35_s29), 0  ;;  %p1285_p8 = scmp.eq.s32.totalorder %s1010_s21, 1 }
  0x32   : > { %1283 = sst [smem:[#allocation14_spill]] %s1304_s29  ;;  %p1068_p6 = por %p50_p4, %p49_p2 }
  0x33   : > { %p1074_p10 = por %p1285_p8, %p49_p2  ;;  %s39_s5 = ssub.s32 %s940_s19, %s1304_s29 }
  0x34   : > { %p710_p12 = scmp.lt.s32.totalorder %s944_s20, 2  ;;  %p40_p11 = scmp.eq.s32.totalorder %s39_s5, 0 }
  0x35   : > { %s193_s27 = sand.u32 1, %s932_s17   ;;  %s641_s8 = sshll.u32 %s940_s19, 8 }
  0x36   : > { %s620_s6 = sshll.u32 %s193_s27, 4  ;;  %s1287_s0 = sld [smem:[#allocation15_spill]] }
  0x37   : > { %s1083_s7 = scalar_select %p40_p11, %s932_s17, %s42_s26  }
  0x38   : > { %s197_s14 = scalar_lea.vmem [#allocation3], %s620_s6  ;;  %p1095_p13 = pnand %p710_p12, %p1068_p6 }
  0x39   : > { %s204_s22 = sshll.u32 %s197_s14, 4  ;;  %s1102_s9 = scalar_lea.hbm %s1264_s1, %s641_s8  ;;  %s1091_s22 = int_to_ptr.vmem [resolvable:$true] %s204_s22 }
  0x3a   : > { %s218_s10 = scalar_lea.vmem [#allocation6], %s620_s6  ;;  %s1106_s2 = scalar_lea.sflag [#allocation4], %s193_s27 }
  0x3b   : > { %s1104_s13 = sshll.u32 %s218_s10, 4  ;;  %p796_p3 = pneg %p1095_p13  ;;  %s1138_s13 = int_to_ptr.vmem [resolvable:$true] %s1104_s13 }
  0x3c   : > { %s1089_s11 = scalar_lea.hbm %s1287_s0, %s641_s8  ;;  %s799_s12 = scalar_lea.hbm %s1287_s0, 512 }
  0x3d   : > { %s794_s14 = scalar_lea.hbm %s1089_s11, 256  ;;  %p800_p9 = scmp.lt.u32.totalorder %s1089_s11, %s1287_s0 }
  0x3e   : > { %p795_p0 = scmp.ne.s32.totalorder %s1089_s11, %s794_s14  ;;  %p801_p1 = scmp.lt.u32.totalorder %s799_s12, %s794_s14 }
  0x3f   : > { %p803_p4 = scmp.lt.u32.totalorder %s794_s14, %s1089_s11 }
  0x40   : > { %p797_p5 = pnand %p796_p3, %p795_p0  ;;  %p802_p2 = por %p801_p1, %p800_p9 }
  0x42   : > { %p798_p7 = pneg %p797_p5  ;;  %p804_p6 = por %p803_p4, %p802_p2 }
  0x44   : > { %p805_p8 = pnand %p804_p6, %p798_p7 }
  0x46   : > { %808 = shalt.err (!%p805_p8)
}
  0x47   : > { %s809_s27 = scalar_lea.vmem %s1091_s22, 256  ;;  %s949_s29 = smov [#allocation3]  }
  0x48   : > { %p810_p12 = scmp.ne.s32.totalorder %s1091_s22, %s809_s27  ;;  %s814_s6 = sshll.u32 %s949_s29, 4  ;;  %s815_s6 = int_to_ptr.vmem [resolvable:$false] %s814_s6 }
  0x49   : > { %s816_s10 = scalar_lea.vmem %s815_s6, 512  ;;  %p817_p5 = scmp.lt.s32.totalorder %s1091_s22, %s815_s6 }
  0x4a   : > { %p812_p11 = pnand %p810_p12, %p796_p3  ;;  %p818_p9 = scmp.lt.s32.totalorder %s816_s10, %s809_s27 }
  0x4c   : > { %p813_p0 = pneg %p812_p11  ;;  %p819_p1 = por %p818_p9, %p817_p5 }
  0x4e   : > { %p820_p2 = pnand %p819_p1, %p813_p0 }
  0x50   : > { %823 = shalt.err (!%p820_p2)
}
  0x51   : > { %s1289_s14 = smov 8   ;;  %s1290_s30 = smov 128  }
  0x52   : > { %701 = dma.hbm_to_vmem [thread:$0]  (!%p1095_p13), %s1089_s11, 256, %s1091_s22, %s1106_s2, %s1290_s30, %s1290_s30, %s1289_s14  }
  0x53   : > { %s214_s12 = sand.u32 1, %s944_s20   ;;  %s824_s8 = scalar_lea.hbm %s1102_s9, 256 }
  0x54   : > { %s1141_s26 = scalar_lea.sflag [#allocation7], %s214_s12  ;;  %p825_p7 = scmp.ne.s32.totalorder %s1102_s9, %s824_s8 }
  0x55   : > { %s829_s6 = scalar_lea.hbm %s1264_s1, 512  ;;  %p830_p8 = scmp.lt.u32.totalorder %s1102_s9, %s1264_s1 }
  0x56   : > { %p827_p4 = pnand %p825_p7, %p796_p3  ;;  %p831_p12 = scmp.lt.u32.totalorder %s829_s6, %s824_s8 }
  0x57   : > { %p833_p0 = scmp.lt.u32.totalorder %s824_s8, %s1102_s9 }
  0x58   : > { %p828_p6 = pneg %p827_p4  ;;  %p832_p11 = por %p831_p12, %p830_p8 }
  0x5a   : > { %p834_p5 = por %p833_p0, %p832_p11 }
  0x5c   : > { %p835_p9 = pnand %p834_p5, %p828_p6 }
  0x5e   : > { %838 = shalt.err (!%p835_p9)
}
  0x5f   : > { %s839_s2 = scalar_lea.vmem %s1138_s13, 256  ;;  %s950_s11 = smov [#allocation6]  }
  0x60   : > { %p840_p1 = scmp.ne.s32.totalorder %s1138_s13, %s839_s2  ;;  %s844_s22 = sshll.u32 %s950_s11, 4  ;;  %s845_s22 = int_to_ptr.vmem [resolvable:$false] %s844_s22 }
  0x61   : > { %s846_s0 = scalar_lea.vmem %s845_s22, 512  ;;  %p847_p4 = scmp.lt.s32.totalorder %s1138_s13, %s845_s22 }
  0x62   : > { %p842_p2 = pnand %p840_p1, %p796_p3  ;;  %p848_p8 = scmp.lt.s32.totalorder %s846_s0, %s839_s2 }
  0x64   : > { %p843_p7 = pneg %p842_p2  ;;  %p849_p12 = por %p848_p8, %p847_p4 }
  0x66   : > { %p850_p11 = pnand %p849_p12, %p843_p7 }
  0x68   : > { %853 = shalt.err (!%p850_p11)
}
  0x69   : > { %704 = dma.hbm_to_vmem [thread:$0]  (!%p1095_p13), %s1102_s9, 256, %s1138_s13, %s1141_s26, %s1290_s30, %s1290_s30, %s1289_s14  }
  0x6a   : > { %p1291_p3 = scmp.ne.s32.totalorder %s1280_s25, 0 }
  0x6b   : > { %s1173_s12 = sand.u32 (!%p1291_p3), 1, %s928_s16   ;;  %p1292_p6 = scmp.ne.s32.totalorder (!%p1291_p3), %s1278_s23, 0 }
  0x6c   : > { %239 = sbr.rel (%p1291_p3) target bundleno = 590 (0x24e), region = 36  ;;  %s1176_s8 = sshll.u32 (!%p1291_p3), %s1173_s12, 4 }
  0x6d   : > { %s242_s5 = scalar_lea.sflag (!%p1291_p3), [#allocation4], %s1173_s12  ;;  %s245_s27 = scalar_lea.vmem (!%p1291_p3), [#allocation3], %s1176_s8 }
  0x73   : > { %907 = dma.done.wait (%p1292_p6), %s242_s5, 256  }
  0x74   : > { %909 = vsyncadd (%p1292_p6), %s242_s5, 4294967040  ;;  %s250_s25 = sand.u32 1, %s1010_s21   ;;  %s254_s9 = scalar_lea.vmem [#allocation6], %s1176_s8 }
  0x75   : > { %s251_s13 = scalar_lea.sflag [#allocation7], %s250_s25 }
  0x76   : > { %911 = dma.done.wait (%p1292_p6), %s251_s13, 256  }
  0x77   : > { %913 = vsyncadd (%p1292_p6), %s251_s13, 4294967040  ;;  %p1293_p13 = scmp.eq.s32.totalorder %s1010_s21, 0 }
  0x79   : > { %915 = dma.done.wait (%p1293_p13), [#allocation7], 512   ;;  %p1294_p0 = pmov %p1293_p13 }
  0x7a   : > { %vm300_vm0 = vcmask 261120   ;;  %v296_v0 = vld [vmem:[#allocation8] sm:$0xff]  ;;  %v297_v1 = vld [vmem:[#allocation8 + $0x8] sm:$0xff]  ;;  %v298_v2 = vld [vmem:[#allocation8 + $0x10] sm:$0xff]  ;;  %vm395_vm1 = vcmask 130048   ;;  %s287_s21 = scalar_lea.vmem [#allocation9], %s1176_s8 }
  0x7b   : > { %917 = vsyncadd (%p1294_p0), [#allocation7], 4294966784  ;;  %v672_v3 = vpack.c.bf16 %v297_v1, %v296_v0  ;;  %v299_v4 = vld [vmem:[#allocation8 + $0x18] sm:$0xff]  ;;  %v294_v5 = vld [vmem:[%s245_s27] sm:$0xff]  ;;  %s496_s23 = sshll.u32 %s287_s21, 4  ;;  %s643_s26 = sshll.u32 %s936_s18, 8  ;;  %s1207_s23 = int_to_ptr.vmem [resolvable:$true] %s496_s23 }
  0x7c   : > { %v676_v6 = vpack.c.bf16 %v299_v4, %v298_v2  ;;  %662 = vmatprep.mubr.msk.f32.mxu0 %vm300_vm0, %v294_v5  ;;  %v295_v7 = vld [vmem:[%s245_s27 + $0x8] sm:$0xff]  ;;  %v384_v8 = vld [vmem:[%s254_s9] sm:$0xff]  ;;  %s1212_s10 = scalar_lea.hbm %s1267_s4, %s643_s26  ;;  %s481_s2 = scalar_lea.sflag [#allocation5], %s1173_s12 }
  0x7d   : > { %673 = vmatprep.subr.bf16.mxu0 %v672_v3  ;;  %669 = vmatprep.mubr.msk.f32.mxu1 %vm395_vm1, %v384_v8  ;;  %v385_v14 = vld [vmem:[%s254_s9 + $0x8] sm:$0xff]  ;;  %v633_v15 = vld [vmem:[%s1266_s3] ss:$0 sm:$0xff]  ;;  %s854_s18 = scalar_lea.vmem %s1207_s23, 256  ;;  %s951_s11 = smov [#allocation9]  }
  0x7e   : > { %675 = vmatpush3.bf16.msra.mxu0 %v672_v3  ;;  %p855_p5 = scmp.ne.s32.totalorder %s1207_s23, %s854_s18  ;;  %s858_s22 = sshll.u32 %s951_s11, 4  ;;  %s859_s22 = int_to_ptr.vmem [resolvable:$false] %s858_s22 }
  0x7f   : > { %677 = vmatprep.subr.bf16.mxu0 %v676_v6  ;;  %s860_s0 = scalar_lea.vmem %s859_s22, 512  ;;  %p861_p2 = scmp.lt.s32.totalorder %s1207_s23, %s859_s22 }
  0x80   : > { %p856_p9 = pnand %p855_p5, %p1074_p10  ;;  %p862_p7 = scmp.lt.s32.totalorder %s860_s0, %s854_s18 }
  0x82   : > { %679 = vmatpush3.bf16.msra.mxu0 %v676_v6  ;;  %p857_p1 = pneg %p856_p9  ;;  %p863_p4 = por %p862_p7, %p861_p2 }
  0x84   : > { %p864_p8 = pnand %p863_p4, %p857_p1 }
  0x85   : > { %663 = vmatmul.mubr.msk.f32.vlgmr.msra.gmra.mrb[0].mxu0 %vm300_vm0, %v295_v7 }
 0x158   : > { %v664_v9 = vpop.f32.mrb[0].mxu0 }
 0x159   : > { %383 = vst.msk [vmem:[#allocation2 + $0x8] sm:$0xff] %vm300_vm0, %v664_v9  ;;  %v373_v10 = vpop.f32.mrb[1].mxu0 }
 0x15a   : > { %382 = vst.msk [vmem:[#allocation2] sm:$0xff] %vm300_vm0, %v373_v10 }
 0x160   : > { %v387_v11 = vld [vmem:[#allocation2 + $0x8] sm:$0xff] }
 0x161   : > { %v386_v12 = vld [vmem:[#allocation2] sm:$0xff] }
 0x162   : > { %v680_v13 = vpack.c.bf16 %v387_v11, %v386_v12 }
 0x164   : > { %681 = vmatprep.subr.bf16.mxu1 %v680_v13 }
 0x165   : > { %683 = vmatpush3.bf16.msra.mxu1 %v680_v13 }
 0x168   : > { %670 = vmatmul.mubr.msk.f32.vlgmr.msra.gmra.mrb[0].mxu1 %vm395_vm1, %v385_v14 }
 0x23b   : > { %v671_v16 = vpop.f32.mrb[0].mxu1 }
 0x23c   : > { %v474_v17 = vadd.f32 %v671_v16, %v633_v15  ;;  %v468_v18 = vpop.f32.mrb[1].mxu1 }
 0x23d   : > { %v469_v19 = vadd.f32 %v633_v15, %v468_v18 }
 0x23e   : > { %479 = vst.msk [vmem:[%s287_s21 + $0x8] sm:$0xff] %vm300_vm0, %v474_v17 }
 0x23f   : > { %478 = vst.msk [vmem:[%s287_s21] sm:$0xff] %vm300_vm0, %v469_v19 }
 0x240   : > { %867 = shalt.err (!%p864_p8)
}
 0x241   : > { %s868_s8 = scalar_lea.hbm %s1212_s10, 256  ;;  %s872_s25 = scalar_lea.hbm %s1267_s4, 512 }
 0x242   : > { %p869_p12 = scmp.ne.s32.totalorder %s1212_s10, %s868_s8  ;;  %p873_p6 = scmp.lt.u32.totalorder %s1212_s10, %s1267_s4 }
 0x243   : > { %p874_p13 = scmp.lt.u32.totalorder %s872_s25, %s868_s8  ;;  %p876_p5 = scmp.lt.u32.totalorder %s868_s8, %s1212_s10 }
 0x244   : > { %p870_p11 = pnand %p869_p12, %p1074_p10 }
 0x245   : > { %p875_p0 = por %p874_p13, %p873_p6 }
 0x246   : > { %p871_p3 = pneg %p870_p11 }
 0x247   : > { %p877_p9 = por %p876_p5, %p875_p0 }
 0x249   : > { %p878_p1 = pnand %p877_p9, %p871_p3 }
 0x24b   : > { %881 = shalt.err (!%p878_p1)
}
 0x24c   : > { %s952_s21 = smov 128   ;;  %s953_s14 = smov 8  }
 0x24d   : > { %692 = dma.vmem_to_hbm [thread:$0]  (%p1074_p10), %s1207_s23, 256, %s1212_s10, %s481_s2, %s952_s21, %s952_s21, %s953_s14  }
 0x24e PF: > { %s511_s30 = sand.u32 1, %s924_s15   ;;  %p1295_p2 = scmp.ne.s32.totalorder %s1279_s24, 0 }
 0x24f   : > { %p1296_p7 = scmp.ge.s32.totalorder %s944_s20, 2  ;;  %s512_s26 = scalar_lea.sflag [#allocation5], %s511_s30 }
 0x251   : > { %p706_p4 = pnand %p1296_p7, %p1295_p2 }
 0x253   : > { %919 = dma.done.wait (!%p706_p4), %s512_s26, 256  }
 0x254   : > { %921 = vsyncadd (!%p706_p4), %s512_s26, 4294967040  ;;  %s23_s20 = sadd.s32 1, %s944_s20   ;;  %s1297_s28 = sld [smem:[#allocation14_spill]] }
 0x255   : > { %p20_p8 = scmp.ge.s32.totalorder %s23_s20, 4   ;;  %s1298_s15 = smov %s928_s16 }
 0x256   : > { %s1299_s16 = smov %s932_s17  ;;  %s1300_s17 = smov %s1083_s7 }
 0x257   : > { %s1301_s18 = smov %s940_s19  ;;  %22 = sbr.rel (!%p20_p8) target bundleno = 11 (0xb), region = 102 }
 0x25a   : > { %s1302_s19 = smov %s1297_s28 }
 0x25e   :  { %517 = vsyncpa [#allocation4], 1 }
 0x25f   :  { %519 = vsyncpa [#allocation4 + $0x1], 1 }
 0x260   :  { %520 = vsyncpa [#allocation7], 1 }
 0x261   :  { %522 = vsyncpa [#allocation7 + $0x1], 1 }
 0x262   :  { %523 = vsyncpa [#allocation5], 1 }
 0x263   :  { %525 = vsyncpa [#allocation5 + $0x1], 1 }

</bundles_post_ra>
